<compile_context>
chip_gen: v5e
topology: v5e:2x2
jax: 0.10.0
libtpu: 0.0.40
codegen_flags: <defaults>
</compile_context>

<pallas_src>
import jax
import jax.numpy as jnp
from jax.experimental import pallas as pl
from jax.experimental.pallas import tpu as pltpu

# ----------------------------- configuration ------------------------------
MAP_H, MAP_W = 8, 8                       # map_size
HW = MAP_H * MAP_W
IN_CH = 8                                 # input_channel (small demo value)
HIDDEN = 32                               # hidden_size (small demo value)
CONV_OUT = 16                             # self.conv_out_size (fixed in module)
CONV_FLATTEN = CONV_OUT * HW              # 1024
UNIT_FEATURE_SIZE = 23 + MAP_H + MAP_W    # 39
X_DIM = IN_CH * HW                        # 512 (channel-major flatten of NCHW input)
UF_PAD = 128                              # unit_feature padded to one full lane group
OUT_PAD = 128                             # lane-dense output blocks
N_ACTIONS = 7                             # len(WorkerAction)
# TODO(synk): WorkerAction/BaseAction/... enums live outside the module; the action
#             count is fixed to 7 and only one actor head (WORKER-style) is built.


# ------------------------------- fused kernel ------------------------------
def _fused_kernel(x_ref, uf_ref,
                  cA, cb1, cw2, cb2, cw3, cb3, cw4, cb4, cwo, cbo,
                  aA, aWu, ab1, aw2, ab2, aw3, ab3, awo, abo,
                  val_ref, pi_ref):
    x = x_ref[...]          # (BT, 512) bf16 -- shared by both branches (single load)
    uf = uf_ref[...]        # (BT, 128) bf16

    def lin(h_bf16, w, b):  # bf16 MXU matmul, f32 accumulate + f32 bias
        return jnp.dot(h_bf16, w[...], preferred_element_type=jnp.float32) + b[...]

    def relu_bf16(h_f32):   # ReLU in f32 (v5e-friendly), cast only the next MXU input
        return jnp.maximum(h_f32, 0.0).astype(jnp.bfloat16)

    # ---- critic branch: folded(conv x3 + Flatten + mlp Linear1) -> 3x Linear+ReLU -> out
    h = relu_bf16(lin(x, cA, cb1))
    h = relu_bf16(lin(h, cw2, cb2))
    h = relu_bf16(lin(h, cw3, cb3))
    h = relu_bf16(lin(h, cw4, cb4))
    val_ref[...] = lin(h, cwo, cbo)          # (BT, 128); real value in column 0

    # ---- actor branch: folded conv part + unit-feature part (no concat) -> MLP -> softmax
    g = jnp.dot(x, aA[...], preferred_element_type=jnp.float32)
    g += jnp.dot(uf, aWu[...], preferred_element_type=jnp.float32)
    g = relu_bf16(g + ab1[...])
    g = relu_bf16(lin(g, aw2, ab2))
    g = relu_bf16(lin(g, aw3, ab3))
    logits = lin(g, awo, abo)                # (BT, 128); columns >= 7 biased to -1e9
    m = jnp.max(logits, axis=-1, keepdims=True)
    e = jnp.exp(logits - m)                  # padding lanes underflow to exactly 0
    pi_ref[...] = e * pl.reciprocal(jnp.sum(e, axis=-1, keepdims=True), approx=True)


# ------------------------------- wrapper ------------------------------------
_WEIGHT_ORDER = ("cA", "cb1", "cw2", "cb2", "cw3", "cb3", "cw4", "cb4", "cwo", "cbo",
                 "aA", "aWu", "ab1", "aw2", "ab2", "aw3", "ab3", "awo", "abo")


def _batch_tile(B):
    if B % 8 != 0:
        return B                      # single block covering the full batch dim
    for cand in (256, 128, 64, 32, 16, 8):
        if B % cand == 0:
            return cand
    return 8


def actor_critic_forward(spatial_feature, unit_feature, params):
    """spatial_feature: NCHW (B, Cin, H, W); unit_feature: (B, 23+H+W).
    Returns (value (B,1), pi (B,N_ACTIONS), hxs=None) like the torch module."""
    B = spatial_feature.shape[0]
    # Channel-major flatten of NCHW is a FREE reshape; the folded weights' rows
    # were permuted at init to consume exactly this ordering.
    x_cm = spatial_feature.reshape(B, X_DIM).astype(jnp.bfloat16)
    uf_pad = jnp.pad(unit_feature,
                     ((0, 0), (0, UF_PAD - UNIT_FEATURE_SIZE))).astype(jnp.bfloat16)

    bt = _batch_tile(B)
    grid = (B // bt,)

    def batch_spec(ncols):
        return pl.BlockSpec((bt, ncols), lambda i: (i, 0))

    def full_spec(arr):
        return pl.BlockSpec(arr.shape, lambda i: (0, 0))

    weights = [params[k] for k in _WEIGHT_ORDER]

    val_pad, pi_pad = pl.pallas_call(
        _fused_kernel,
        grid=grid,
        in_specs=[batch_spec(X_DIM), batch_spec(UF_PAD)] + [full_spec(w) for w in weights],
        out_specs=(batch_spec(OUT_PAD), batch_spec(OUT_PAD)),
        out_shape=(jax.ShapeDtypeStruct((B, OUT_PAD), jnp.float32),
                   jax.ShapeDtypeStruct((B, OUT_PAD), jnp.float32)),
        compiler_params=pltpu.CompilerParams(dimension_semantics=("parallel",)),
    )(x_cm, uf_pad, *weights)

    value = val_pad[:, :1]
    pi = pi_pad[:, :N_ACTIONS]
    return value, pi, None            # recurrent=False -> hxs is None


# ---------------------------- parameter init --------------------------------
def _linear_init(key, fan_in, fan_out):
    # TODO(synk): deterministic scaled-normal stand-in for nn.init.orthogonal_; bias = 0.
    w = jax.random.normal(key, (fan_in, fan_out), jnp.float32) / jnp.sqrt(jnp.float32(fan_in))
    b = jnp.zeros((fan_out,), jnp.float32)
    return w, b


def init_raw_params(key):
    """Unfolded, f32 parameters mirroring the torch module's layers (in,out layout)."""
    keys = iter(jax.random.split(key, 16))

    def conv_branch():
        w1, b1 = _linear_init(next(keys), IN_CH, 64)
        w2, b2 = _linear_init(next(keys), 64, 32)
        w3, b3 = _linear_init(next(keys), 32, CONV_OUT)
        return dict(w1=w1, b1=b1, w2=w2, b2=b2, w3=w3, b3=b3)

    critic_conv = conv_branch()
    actor_conv = conv_branch()

    cm = {}
    cm["w1"], cm["b1"] = _linear_init(next(keys), CONV_FLATTEN, HIDDEN)
    cm["w2"], cm["b2"] = _linear_init(next(keys), HIDDEN, HIDDEN)
    cm["w3"], cm["b3"] = _linear_init(next(keys), HIDDEN, HIDDEN)
    cm["w4"], cm["b4"] = _linear_init(next(keys), HIDDEN, HIDDEN)
    cm["wo"], cm["bo"] = _linear_init(next(keys), HIDDEN, 1)

    ah = {}
    ah["w1"], ah["b1"] = _linear_init(next(keys), CONV_FLATTEN + UNIT_FEATURE_SIZE, HIDDEN)
    ah["w2"], ah["b2"] = _linear_init(next(keys), HIDDEN, HIDDEN)
    ah["w3"], ah["b3"] = _linear_init(next(keys), HIDDEN, HIDDEN)
    ah["wo"], ah["bo"] = _linear_init(next(keys), HIDDEN, N_ACTIONS)

    return dict(critic_conv=critic_conv, actor_conv=actor_conv,
                critic_mlp=cm, actor_head=ah)


def _fold_conv_into_linear1(conv_p, w1_convpart, b1):
    """Collapse conv1∘conv2∘conv3 (no activations, identity pool) + channel-major
    Flatten + first Linear into a single affine map consuming the free
    channel-major reshape of the NCHW input.  Done once, offline, in f32."""
    Wc = conv_p["w1"] @ conv_p["w2"] @ conv_p["w3"]                               # (Cin, 16)
    bc = conv_p["b1"] @ conv_p["w2"] @ conv_p["w3"] + conv_p["b2"] @ conv_p["w3"] \
         + conv_p["b3"]                                                           # (16,)
    w1r = w1_convpart.reshape(CONV_OUT, HW, HIDDEN)      # rows are torch-Flatten order d*HW+p
    A = jnp.einsum("cd,dph->cph", Wc, w1r).reshape(X_DIM, HIDDEN)  # rows: c*HW+p (input order)
    bias = bc @ w1r.sum(axis=1) + b1                                               # (HIDDEN,)
    return A, bias


def pack_kernel_params(raw):
    """Fold / split / pad the raw parameters into the fused-kernel layout."""
    cm, ah = raw["critic_mlp"], raw["actor_head"]

    cA, cb1 = _fold_conv_into_linear1(raw["critic_conv"], cm["w1"], cm["b1"])

    a_w1_conv = ah["w1"][:CONV_FLATTEN]
    a_w1_uf = ah["w1"][CONV_FLATTEN:]
    aA, ab1 = _fold_conv_into_linear1(raw["actor_conv"], a_w1_conv, ah["b1"])
    aWu = jnp.zeros((UF_PAD, HIDDEN), jnp.float32).at[:UNIT_FEATURE_SIZE].set(a_w1_uf)

    # Lane-dense padded output heads.
    cwo = jnp.zeros((HIDDEN, OUT_PAD), jnp.float32).at[:, :1].set(cm["wo"])
    cbo = jnp.zeros((OUT_PAD,), jnp.float32).at[:1].set(cm["bo"])
    awo = jnp.zeros((HIDDEN, OUT_PAD), jnp.float32).at[:, :N_ACTIONS].set(ah["wo"])
    abo = jnp.full((OUT_PAD,), -1e9, jnp.float32).at[:N_ACTIONS].set(ah["bo"])

    def w(x):   # MXU inputs in bf16
        return x.astype(jnp.bfloat16)

    def b(x):   # biases stay f32, as (1, N) rows
        return x.reshape(1, -1).astype(jnp.float32)

    return dict(
        cA=w(cA), cb1=b(cb1), cw2=w(cm["w2"]), cb2=b(cm["b2"]),
        cw3=w(cm["w3"]), cb3=b(cm["b3"]), cw4=w(cm["w4"]), cb4=b(cm["b4"]),
        cwo=w(cwo), cbo=b(cbo),
        aA=w(aA), aWu=w(aWu), ab1=b(ab1),
        aw2=w(ah["w2"]), ab2=b(ah["b2"]), aw3=w(ah["w3"]), ab3=b(ah["b3"]),
        awo=w(awo), abo=b(abo),
    )


# ---------------------- pure-JAX reference (unfolded, f32) -------------------
def reference_forward(spatial_feature, unit_feature, raw):
    B = spatial_feature.shape[0]
    x = spatial_feature.reshape(B, IN_CH, HW).transpose(0, 2, 1)   # (B, HW, Cin)

    def conv_flat(p):
        h = x @ p["w1"] + p["b1"]
        h = h @ p["w2"] + p["b2"]
        h = h @ p["w3"] + p["b3"]
        # AdaptiveMaxPool2d(map_size) is identity; torch Flatten is channel-major (NCHW)
        return h.transpose(0, 2, 1).reshape(B, CONV_FLATTEN)

    cm = raw["critic_mlp"]
    h = conv_flat(raw["critic_conv"])
    for k in ("1", "2", "3", "4"):
        h = jnp.maximum(h @ cm["w" + k] + cm["b" + k], 0.0)
    value = h @ cm["wo"] + cm["bo"]

    ah = raw["actor_head"]
    g = jnp.concatenate([conv_flat(raw["actor_conv"]), unit_feature], axis=1)
    for k in ("1", "2", "3"):
        g = jnp.maximum(g @ ah["w" + k] + ah["b" + k], 0.0)
    pi = jax.nn.softmax(g @ ah["wo"] + ah["bo"], axis=-1)
    return value, pi


# --------------------------------- main -------------------------------------
if __name__ == "__main__":
    root = jax.random.PRNGKey(0)
    k_params, k_sp, k_uf = jax.random.split(root, 3)

    B = 2
    spatial_feature = jax.random.normal(k_sp, (B, IN_CH, MAP_H, MAP_W), jnp.float32)
    unit_feature = jax.random.normal(k_uf, (B, UNIT_FEATURE_SIZE), jnp.float32)

    raw = init_raw_params(k_params)
    params = pack_kernel_params(raw)

    fwd = jax.jit(actor_critic_forward)
    value, pi, hxs = fwd(spatial_feature, unit_feature, params)
    value, pi = jax.block_until_ready((value, pi))

    assert value.shape == (B, 1)
    assert pi.shape == (B, N_ACTIONS)
    assert hxs is None
    # softmax rows sum to 1 (approx EUP reciprocal -> ~1e-3 accuracy)
    assert bool(jnp.all(jnp.abs(jnp.sum(pi, axis=-1) - 1.0) < 1e-2))
    assert bool(jnp.all(jnp.isfinite(value)))

    # correctness vs the unfolded f32 reference (bf16 MXU inputs -> loose tolerance)
    v_ref, pi_ref = reference_forward(spatial_feature, unit_feature, raw)
    assert bool(jnp.all(jnp.abs(value - v_ref) < 5e-2))
    assert bool(jnp.all(jnp.abs(pi - pi_ref) < 5e-2))

    print("KERNEL_OK")
</pallas_src>

<mosaic_0001>
module attributes {stable_mosaic.version = 11 : i64} {
  func.func @_fused_kernel(%arg0: i32, %arg1: memref<2x512xbf16, #tpu.memory_space<vmem>>, %arg2: memref<2x128xbf16, #tpu.memory_space<vmem>>, %arg3: memref<512x32xbf16, #tpu.memory_space<vmem>>, %arg4: memref<1x32xf32, #tpu.memory_space<vmem>>, %arg5: memref<32x32xbf16, #tpu.memory_space<vmem>>, %arg6: memref<1x32xf32, #tpu.memory_space<vmem>>, %arg7: memref<32x32xbf16, #tpu.memory_space<vmem>>, %arg8: memref<1x32xf32, #tpu.memory_space<vmem>>, %arg9: memref<32x32xbf16, #tpu.memory_space<vmem>>, %arg10: memref<1x32xf32, #tpu.memory_space<vmem>>, %arg11: memref<32x128xbf16, #tpu.memory_space<vmem>>, %arg12: memref<1x128xf32, #tpu.memory_space<vmem>>, %arg13: memref<512x32xbf16, #tpu.memory_space<vmem>>, %arg14: memref<128x32xbf16, #tpu.memory_space<vmem>>, %arg15: memref<1x32xf32, #tpu.memory_space<vmem>>, %arg16: memref<32x32xbf16, #tpu.memory_space<vmem>>, %arg17: memref<1x32xf32, #tpu.memory_space<vmem>>, %arg18: memref<32x32xbf16, #tpu.memory_space<vmem>>, %arg19: memref<1x32xf32, #tpu.memory_space<vmem>>, %arg20: memref<32x128xbf16, #tpu.memory_space<vmem>>, %arg21: memref<1x128xf32, #tpu.memory_space<vmem>>, %arg22: memref<2x128xf32, #tpu.memory_space<vmem>>, %arg23: memref<2x128xf32, #tpu.memory_space<vmem>>) attributes {dimension_semantics = [#tpu.dimension_semantics<parallel>], iteration_bounds = array<i64: 1>, scalar_prefetch = 0 : i64, scratch_operands = 0 : i64, tpu.core_type = #tpu.core_type<tc>, window_params = [{transform_indices = @transform_0, window_bounds = array<i64: 2, 512>}, {transform_indices = @transform_1, window_bounds = array<i64: 2, 128>}, {pipeline_mode = #tpu.pipeline_mode<synchronous>, transform_indices = @transform_2, window_bounds = array<i64: 512, 32>}, {pipeline_mode = #tpu.pipeline_mode<synchronous>, transform_indices = @transform_3, window_bounds = array<i64: 1, 32>}, {pipeline_mode = #tpu.pipeline_mode<synchronous>, transform_indices = @transform_4, window_bounds = array<i64: 32, 32>}, {pipeline_mode = #tpu.pipeline_mode<synchronous>, transform_indices = @transform_5, window_bounds = array<i64: 1, 32>}, {pipeline_mode = #tpu.pipeline_mode<synchronous>, transform_indices = @transform_6, window_bounds = array<i64: 32, 32>}, {pipeline_mode = #tpu.pipeline_mode<synchronous>, transform_indices = @transform_7, window_bounds = array<i64: 1, 32>}, {pipeline_mode = #tpu.pipeline_mode<synchronous>, transform_indices = @transform_8, window_bounds = array<i64: 32, 32>}, {pipeline_mode = #tpu.pipeline_mode<synchronous>, transform_indices = @transform_9, window_bounds = array<i64: 1, 32>}, {pipeline_mode = #tpu.pipeline_mode<synchronous>, transform_indices = @transform_10, window_bounds = array<i64: 32, 128>}, {pipeline_mode = #tpu.pipeline_mode<synchronous>, transform_indices = @transform_11, window_bounds = array<i64: 1, 128>}, {pipeline_mode = #tpu.pipeline_mode<synchronous>, transform_indices = @transform_12, window_bounds = array<i64: 512, 32>}, {pipeline_mode = #tpu.pipeline_mode<synchronous>, transform_indices = @transform_13, window_bounds = array<i64: 128, 32>}, {pipeline_mode = #tpu.pipeline_mode<synchronous>, transform_indices = @transform_14, window_bounds = array<i64: 1, 32>}, {pipeline_mode = #tpu.pipeline_mode<synchronous>, transform_indices = @transform_15, window_bounds = array<i64: 32, 32>}, {pipeline_mode = #tpu.pipeline_mode<synchronous>, transform_indices = @transform_16, window_bounds = array<i64: 1, 32>}, {pipeline_mode = #tpu.pipeline_mode<synchronous>, transform_indices = @transform_17, window_bounds = array<i64: 32, 32>}, {pipeline_mode = #tpu.pipeline_mode<synchronous>, transform_indices = @transform_18, window_bounds = array<i64: 1, 32>}, {pipeline_mode = #tpu.pipeline_mode<synchronous>, transform_indices = @transform_19, window_bounds = array<i64: 32, 128>}, {pipeline_mode = #tpu.pipeline_mode<synchronous>, transform_indices = @transform_20, window_bounds = array<i64: 1, 128>}, {transform_indices = @transform_21, window_bounds = array<i64: 2, 128>}, {transform_indices = @transform_22, window_bounds = array<i64: 2, 128>}]} {
    %c0 = arith.constant 0 : index
    %c0_0 = arith.constant 0 : index
    %0 = vector.load %arg1[%c0, %c0_0] : memref<2x512xbf16, #tpu.memory_space<vmem>>, vector<2x512xbf16>
    %c0_1 = arith.constant 0 : index
    %c0_2 = arith.constant 0 : index
    %1 = vector.load %arg2[%c0_1, %c0_2] : memref<2x128xbf16, #tpu.memory_space<vmem>>, vector<2x128xbf16>
    %c0_3 = arith.constant 0 : index
    %c0_4 = arith.constant 0 : index
    %2 = vector.load %arg3[%c0_3, %c0_4] : memref<512x32xbf16, #tpu.memory_space<vmem>>, vector<512x32xbf16>
    %cst = arith.constant dense<0.000000e+00> : vector<2x32xf32>
    %3 = tpu.matmul %0, %2, %cst {dimension_numbers = #tpu.dot_dimension_numbers<[1], [0], [0], [1], [0, 0, 1, 1], [], []>} : vector<2x512xbf16>, vector<512x32xbf16>, vector<2x32xf32> -> vector<2x32xf32>
    %c0_5 = arith.constant 0 : index
    %c0_6 = arith.constant 0 : index
    %4 = vector.load %arg4[%c0_5, %c0_6] : memref<1x32xf32, #tpu.memory_space<vmem>>, vector<1x32xf32>
    %5 = vector.broadcast %4 : vector<1x32xf32> to vector<2x32xf32>
    %6 = arith.addf %3, %5 : vector<2x32xf32>
    %cst_7 = arith.constant 0.000000e+00 : f32
    %7 = vector.broadcast %cst_7 : f32 to vector<2x32xf32>
    %8 = arith.maximumf %6, %7 : vector<2x32xf32>
    %9 = arith.truncf %8 : vector<2x32xf32> to vector<2x32xbf16>
    %c0_8 = arith.constant 0 : index
    %c0_9 = arith.constant 0 : index
    %10 = vector.load %arg5[%c0_8, %c0_9] : memref<32x32xbf16, #tpu.memory_space<vmem>>, vector<32x32xbf16>
    %cst_10 = arith.constant dense<0.000000e+00> : vector<2x32xf32>
    %11 = tpu.matmul %9, %10, %cst_10 {dimension_numbers = #tpu.dot_dimension_numbers<[1], [0], [0], [1], [0, 0, 1, 1], [], []>} : vector<2x32xbf16>, vector<32x32xbf16>, vector<2x32xf32> -> vector<2x32xf32>
    %c0_11 = arith.constant 0 : index
    %c0_12 = arith.constant 0 : index
    %12 = vector.load %arg6[%c0_11, %c0_12] : memref<1x32xf32, #tpu.memory_space<vmem>>, vector<1x32xf32>
    %13 = vector.broadcast %12 : vector<1x32xf32> to vector<2x32xf32>
    %14 = arith.addf %11, %13 : vector<2x32xf32>
    %cst_13 = arith.constant 0.000000e+00 : f32
    %15 = vector.broadcast %cst_13 : f32 to vector<2x32xf32>
    %16 = arith.maximumf %14, %15 : vector<2x32xf32>
    %17 = arith.truncf %16 : vector<2x32xf32> to vector<2x32xbf16>
    %c0_14 = arith.constant 0 : index
    %c0_15 = arith.constant 0 : index
    %18 = vector.load %arg7[%c0_14, %c0_15] : memref<32x32xbf16, #tpu.memory_space<vmem>>, vector<32x32xbf16>
    %cst_16 = arith.constant dense<0.000000e+00> : vector<2x32xf32>
    %19 = tpu.matmul %17, %18, %cst_16 {dimension_numbers = #tpu.dot_dimension_numbers<[1], [0], [0], [1], [0, 0, 1, 1], [], []>} : vector<2x32xbf16>, vector<32x32xbf16>, vector<2x32xf32> -> vector<2x32xf32>
    %c0_17 = arith.constant 0 : index
    %c0_18 = arith.constant 0 : index
    %20 = vector.load %arg8[%c0_17, %c0_18] : memref<1x32xf32, #tpu.memory_space<vmem>>, vector<1x32xf32>
    %21 = vector.broadcast %20 : vector<1x32xf32> to vector<2x32xf32>
    %22 = arith.addf %19, %21 : vector<2x32xf32>
    %cst_19 = arith.constant 0.000000e+00 : f32
    %23 = vector.broadcast %cst_19 : f32 to vector<2x32xf32>
    %24 = arith.maximumf %22, %23 : vector<2x32xf32>
    %25 = arith.truncf %24 : vector<2x32xf32> to vector<2x32xbf16>
    %c0_20 = arith.constant 0 : index
    %c0_21 = arith.constant 0 : index
    %26 = vector.load %arg9[%c0_20, %c0_21] : memref<32x32xbf16, #tpu.memory_space<vmem>>, vector<32x32xbf16>
    %cst_22 = arith.constant dense<0.000000e+00> : vector<2x32xf32>
    %27 = tpu.matmul %25, %26, %cst_22 {dimension_numbers = #tpu.dot_dimension_numbers<[1], [0], [0], [1], [0, 0, 1, 1], [], []>} : vector<2x32xbf16>, vector<32x32xbf16>, vector<2x32xf32> -> vector<2x32xf32>
    %c0_23 = arith.constant 0 : index
    %c0_24 = arith.constant 0 : index
    %28 = vector.load %arg10[%c0_23, %c0_24] : memref<1x32xf32, #tpu.memory_space<vmem>>, vector<1x32xf32>
    %29 = vector.broadcast %28 : vector<1x32xf32> to vector<2x32xf32>
    %30 = arith.addf %27, %29 : vector<2x32xf32>
    %cst_25 = arith.constant 0.000000e+00 : f32
    %31 = vector.broadcast %cst_25 : f32 to vector<2x32xf32>
    %32 = arith.maximumf %30, %31 : vector<2x32xf32>
    %33 = arith.truncf %32 : vector<2x32xf32> to vector<2x32xbf16>
    %c0_26 = arith.constant 0 : index
    %c0_27 = arith.constant 0 : index
    %34 = vector.load %arg11[%c0_26, %c0_27] : memref<32x128xbf16, #tpu.memory_space<vmem>>, vector<32x128xbf16>
    %cst_28 = arith.constant dense<0.000000e+00> : vector<2x128xf32>
    %35 = tpu.matmul %33, %34, %cst_28 {dimension_numbers = #tpu.dot_dimension_numbers<[1], [0], [0], [1], [0, 0, 1, 1], [], []>} : vector<2x32xbf16>, vector<32x128xbf16>, vector<2x128xf32> -> vector<2x128xf32>
    %c0_29 = arith.constant 0 : index
    %c0_30 = arith.constant 0 : index
    %36 = vector.load %arg12[%c0_29, %c0_30] : memref<1x128xf32, #tpu.memory_space<vmem>>, vector<1x128xf32>
    %37 = vector.broadcast %36 : vector<1x128xf32> to vector<2x128xf32>
    %38 = arith.addf %35, %37 : vector<2x128xf32>
    %c0_31 = arith.constant 0 : index
    %c0_32 = arith.constant 0 : index
    %39 = vector.load %arg22[%c0_31, %c0_32] : memref<2x128xf32, #tpu.memory_space<vmem>>, vector<2x128xf32>
    tpu.vector_store %arg22[%c0_31, %c0_32], %38 {strides = array<i32>} : memref<2x128xf32, #tpu.memory_space<vmem>>, vector<2x128xf32>,
    %c0_33 = arith.constant 0 : index
    %c0_34 = arith.constant 0 : index
    %40 = vector.load %arg13[%c0_33, %c0_34] : memref<512x32xbf16, #tpu.memory_space<vmem>>, vector<512x32xbf16>
    %cst_35 = arith.constant dense<0.000000e+00> : vector<2x32xf32>
    %41 = tpu.matmul %0, %40, %cst_35 {dimension_numbers = #tpu.dot_dimension_numbers<[1], [0], [0], [1], [0, 0, 1, 1], [], []>} : vector<2x512xbf16>, vector<512x32xbf16>, vector<2x32xf32> -> vector<2x32xf32>
    %c0_36 = arith.constant 0 : index
    %c0_37 = arith.constant 0 : index
    %42 = vector.load %arg14[%c0_36, %c0_37] : memref<128x32xbf16, #tpu.memory_space<vmem>>, vector<128x32xbf16>
    %cst_38 = arith.constant dense<0.000000e+00> : vector<2x32xf32>
    %43 = tpu.matmul %1, %42, %cst_38 {dimension_numbers = #tpu.dot_dimension_numbers<[1], [0], [0], [1], [0, 0, 1, 1], [], []>} : vector<2x128xbf16>, vector<128x32xbf16>, vector<2x32xf32> -> vector<2x32xf32>
    %44 = arith.addf %41, %43 : vector<2x32xf32>
    %c0_39 = arith.constant 0 : index
    %c0_40 = arith.constant 0 : index
    %45 = vector.load %arg15[%c0_39, %c0_40] : memref<1x32xf32, #tpu.memory_space<vmem>>, vector<1x32xf32>
    %46 = vector.broadcast %45 : vector<1x32xf32> to vector<2x32xf32>
    %47 = arith.addf %44, %46 : vector<2x32xf32>
    %cst_41 = arith.constant 0.000000e+00 : f32
    %48 = vector.broadcast %cst_41 : f32 to vector<2x32xf32>
    %49 = arith.maximumf %47, %48 : vector<2x32xf32>
    %50 = arith.truncf %49 : vector<2x32xf32> to vector<2x32xbf16>
    %c0_42 = arith.constant 0 : index
    %c0_43 = arith.constant 0 : index
    %51 = vector.load %arg16[%c0_42, %c0_43] : memref<32x32xbf16, #tpu.memory_space<vmem>>, vector<32x32xbf16>
    %cst_44 = arith.constant dense<0.000000e+00> : vector<2x32xf32>
    %52 = tpu.matmul %50, %51, %cst_44 {dimension_numbers = #tpu.dot_dimension_numbers<[1], [0], [0], [1], [0, 0, 1, 1], [], []>} : vector<2x32xbf16>, vector<32x32xbf16>, vector<2x32xf32> -> vector<2x32xf32>
    %c0_45 = arith.constant 0 : index
    %c0_46 = arith.constant 0 : index
    %53 = vector.load %arg17[%c0_45, %c0_46] : memref<1x32xf32, #tpu.memory_space<vmem>>, vector<1x32xf32>
    %54 = vector.broadcast %53 : vector<1x32xf32> to vector<2x32xf32>
    %55 = arith.addf %52, %54 : vector<2x32xf32>
    %cst_47 = arith.constant 0.000000e+00 : f32
    %56 = vector.broadcast %cst_47 : f32 to vector<2x32xf32>
    %57 = arith.maximumf %55, %56 : vector<2x32xf32>
    %58 = arith.truncf %57 : vector<2x32xf32> to vector<2x32xbf16>
    %c0_48 = arith.constant 0 : index
    %c0_49 = arith.constant 0 : index
    %59 = vector.load %arg18[%c0_48, %c0_49] : memref<32x32xbf16, #tpu.memory_space<vmem>>, vector<32x32xbf16>
    %cst_50 = arith.constant dense<0.000000e+00> : vector<2x32xf32>
    %60 = tpu.matmul %58, %59, %cst_50 {dimension_numbers = #tpu.dot_dimension_numbers<[1], [0], [0], [1], [0, 0, 1, 1], [], []>} : vector<2x32xbf16>, vector<32x32xbf16>, vector<2x32xf32> -> vector<2x32xf32>
    %c0_51 = arith.constant 0 : index
    %c0_52 = arith.constant 0 : index
    %61 = vector.load %arg19[%c0_51, %c0_52] : memref<1x32xf32, #tpu.memory_space<vmem>>, vector<1x32xf32>
    %62 = vector.broadcast %61 : vector<1x32xf32> to vector<2x32xf32>
    %63 = arith.addf %60, %62 : vector<2x32xf32>
    %cst_53 = arith.constant 0.000000e+00 : f32
    %64 = vector.broadcast %cst_53 : f32 to vector<2x32xf32>
    %65 = arith.maximumf %63, %64 : vector<2x32xf32>
    %66 = arith.truncf %65 : vector<2x32xf32> to vector<2x32xbf16>
    %c0_54 = arith.constant 0 : index
    %c0_55 = arith.constant 0 : index
    %67 = vector.load %arg20[%c0_54, %c0_55] : memref<32x128xbf16, #tpu.memory_space<vmem>>, vector<32x128xbf16>
    %cst_56 = arith.constant dense<0.000000e+00> : vector<2x128xf32>
    %68 = tpu.matmul %66, %67, %cst_56 {dimension_numbers = #tpu.dot_dimension_numbers<[1], [0], [0], [1], [0, 0, 1, 1], [], []>} : vector<2x32xbf16>, vector<32x128xbf16>, vector<2x128xf32> -> vector<2x128xf32>
    %c0_57 = arith.constant 0 : index
    %c0_58 = arith.constant 0 : index
    %69 = vector.load %arg21[%c0_57, %c0_58] : memref<1x128xf32, #tpu.memory_space<vmem>>, vector<1x128xf32>
    %70 = vector.broadcast %69 : vector<1x128xf32> to vector<2x128xf32>
    %71 = arith.addf %68, %70 : vector<2x128xf32>
    %cst_59 = arith.constant dense<0xFF800000> : vector<2xf32>
    %72 = vector.multi_reduction <maximumf>, %71, %cst_59 [1] : vector<2x128xf32> to vector<2xf32>
    %73 = vector.shape_cast %72 : vector<2xf32> to vector<2x1xf32>
    %74 = vector.broadcast %73 : vector<2x1xf32> to vector<2x128xf32>
    %75 = arith.subf %71, %74 : vector<2x128xf32>
    %76 = math.exp %75 : vector<2x128xf32>
    %cst_60 = arith.constant dense<0.000000e+00> : vector<2xf32>
    %77 = vector.multi_reduction <add>, %76, %cst_60 [1] : vector<2x128xf32> to vector<2xf32>
    %78 = vector.shape_cast %77 : vector<2xf32> to vector<2x1xf32>
    %79 = tpu.reciprocal %78 {approx = true} : vector<2x1xf32> -> vector<2x1xf32>
    %80 = vector.broadcast %79 : vector<2x1xf32> to vector<2x128xf32>
    %81 = arith.mulf %76, %80 : vector<2x128xf32>
    %c0_61 = arith.constant 0 : index
    %c0_62 = arith.constant 0 : index
    %82 = vector.load %arg23[%c0_61, %c0_62] : memref<2x128xf32, #tpu.memory_space<vmem>>, vector<2x128xf32>
    tpu.vector_store %arg23[%c0_61, %c0_62], %81 {strides = array<i32>} : memref<2x128xf32, #tpu.memory_space<vmem>>, vector<2x128xf32>,
    return
  }
  func.func @transform_0(%arg0: i32) -> (i32, i32) {
    %c0_i32 = arith.constant 0 : i32
    %c0_i32_0 = arith.constant 0 : i32
    return %arg0, %c0_i32 : i32, i32
  }
  func.func @transform_1(%arg0: i32) -> (i32, i32) {
    %c0_i32 = arith.constant 0 : i32
    %c0_i32_0 = arith.constant 0 : i32
    return %arg0, %c0_i32 : i32, i32
  }
  func.func @transform_2(%arg0: i32) -> (i32, i32) {
    %c0_i32 = arith.constant 0 : i32
    %c0_i32_0 = arith.constant 0 : i32
    %c0_i32_1 = arith.constant 0 : i32
    return %c0_i32, %c0_i32_0 : i32, i32
  }
  func.func @transform_3(%arg0: i32) -> (i32, i32) {
    %c0_i32 = arith.constant 0 : i32
    %c0_i32_0 = arith.constant 0 : i32
    %c0_i32_1 = arith.constant 0 : i32
    return %c0_i32, %c0_i32_0 : i32, i32
  }
  func.func @transform_4(%arg0: i32) -> (i32, i32) {
    %c0_i32 = arith.constant 0 : i32
    %c0_i32_0 = arith.constant 0 : i32
    %c0_i32_1 = arith.constant 0 : i32
    return %c0_i32, %c0_i32_0 : i32, i32
  }
  func.func @transform_5(%arg0: i32) -> (i32, i32) {
    %c0_i32 = arith.constant 0 : i32
    %c0_i32_0 = arith.constant 0 : i32
    %c0_i32_1 = arith.constant 0 : i32
    return %c0_i32, %c0_i32_0 : i32, i32
  }
  func.func @transform_6(%arg0: i32) -> (i32, i32) {
    %c0_i32 = arith.constant 0 : i32
    %c0_i32_0 = arith.constant 0 : i32
    %c0_i32_1 = arith.constant 0 : i32
    return %c0_i32, %c0_i32_0 : i32, i32
  }
  func.func @transform_7(%arg0: i32) -> (i32, i32) {
    %c0_i32 = arith.constant 0 : i32
    %c0_i32_0 = arith.constant 0 : i32
    %c0_i32_1 = arith.constant 0 : i32
    return %c0_i32, %c0_i32_0 : i32, i32
  }
  func.func @transform_8(%arg0: i32) -> (i32, i32) {
    %c0_i32 = arith.constant 0 : i32
    %c0_i32_0 = arith.constant 0 : i32
    %c0_i32_1 = arith.constant 0 : i32
    return %c0_i32, %c0_i32_0 : i32, i32
  }
  func.func @transform_9(%arg0: i32) -> (i32, i32) {
    %c0_i32 = arith.constant 0 : i32
    %c0_i32_0 = arith.constant 0 : i32
    %c0_i32_1 = arith.constant 0 : i32
    return %c0_i32, %c0_i32_0 : i32, i32
  }
  func.func @transform_10(%arg0: i32) -> (i32, i32) {
    %c0_i32 = arith.constant 0 : i32
    %c0_i32_0 = arith.constant 0 : i32
    %c0_i32_1 = arith.constant 0 : i32
    return %c0_i32, %c0_i32_0 : i32, i32
  }
  func.func @transform_11(%arg0: i32) -> (i32, i32) {
    %c0_i32 = arith.constant 0 : i32
    %c0_i32_0 = arith.constant 0 : i32
    %c0_i32_1 = arith.constant 0 : i32
    return %c0_i32, %c0_i32_0 : i32, i32
  }
  func.func @transform_12(%arg0: i32) -> (i32, i32) {
    %c0_i32 = arith.constant 0 : i32
    %c0_i32_0 = arith.constant 0 : i32
    %c0_i32_1 = arith.constant 0 : i32
    return %c0_i32, %c0_i32_0 : i32, i32
  }
  func.func @transform_13(%arg0: i32) -> (i32, i32) {
    %c0_i32 = arith.constant 0 : i32
    %c0_i32_0 = arith.constant 0 : i32
    %c0_i32_1 = arith.constant 0 : i32
    return %c0_i32, %c0_i32_0 : i32, i32
  }
  func.func @transform_14(%arg0: i32) -> (i32, i32) {
    %c0_i32 = arith.constant 0 : i32
    %c0_i32_0 = arith.constant 0 : i32
    %c0_i32_1 = arith.constant 0 : i32
    return %c0_i32, %c0_i32_0 : i32, i32
  }
  func.func @transform_15(%arg0: i32) -> (i32, i32) {
    %c0_i32 = arith.constant 0 : i32
    %c0_i32_0 = arith.constant 0 : i32
    %c0_i32_1 = arith.constant 0 : i32
    return %c0_i32, %c0_i32_0 : i32, i32
  }
  func.func @transform_16(%arg0: i32) -> (i32, i32) {
    %c0_i32 = arith.constant 0 : i32
    %c0_i32_0 = arith.constant 0 : i32
    %c0_i32_1 = arith.constant 0 : i32
    return %c0_i32, %c0_i32_0 : i32, i32
  }
  func.func @transform_17(%arg0: i32) -> (i32, i32) {
    %c0_i32 = arith.constant 0 : i32
    %c0_i32_0 = arith.constant 0 : i32
    %c0_i32_1 = arith.constant 0 : i32
    return %c0_i32, %c0_i32_0 : i32, i32
  }
  func.func @transform_18(%arg0: i32) -> (i32, i32) {
    %c0_i32 = arith.constant 0 : i32
    %c0_i32_0 = arith.constant 0 : i32
    %c0_i32_1 = arith.constant 0 : i32
    return %c0_i32, %c0_i32_0 : i32, i32
  }
  func.func @transform_19(%arg0: i32) -> (i32, i32) {
    %c0_i32 = arith.constant 0 : i32
    %c0_i32_0 = arith.constant 0 : i32
    %c0_i32_1 = arith.constant 0 : i32
    return %c0_i32, %c0_i32_0 : i32, i32
  }
  func.func @transform_20(%arg0: i32) -> (i32, i32) {
    %c0_i32 = arith.constant 0 : i32
    %c0_i32_0 = arith.constant 0 : i32
    %c0_i32_1 = arith.constant 0 : i32
    return %c0_i32, %c0_i32_0 : i32, i32
  }
  func.func @transform_21(%arg0: i32) -> (i32, i32) {
    %c0_i32 = arith.constant 0 : i32
    %c0_i32_0 = arith.constant 0 : i32
    return %arg0, %c0_i32 : i32, i32
  }
  func.func @transform_22(%arg0: i32) -> (i32, i32) {
    %c0_i32 = arith.constant 0 : i32
    %c0_i32_0 = arith.constant 0 : i32
    return %arg0, %c0_i32 : i32, i32
  }
}

</mosaic_0001>

<bundles_post_ra>
// kernel: actor_critic_forward.1
= control target key start
LH: loop header
LB: loop body
LE: loop exit
PB: predicated region body
PF: predicated region fallthrough
CT: control target
= control target key end

     0   :  { %s1993_s0 = inlined_call_operand.vmem [shape: bf16[2,512], index: 0, kind: input, shape index: {}]   ;;  %s1994_s1 = inlined_call_operand.vmem [shape: bf16[2,128], index: 1, kind: input, shape index: {}]   ;;  %s1995_s2 = inlined_call_operand.vmem [shape: bf16[512,32], index: 2, kind: input, shape index: {}]   ;;  %s1996_s3 = inlined_call_operand.vmem [shape: f32[1,32], index: 3, kind: input, shape index: {}]   ;;  %s1997_s4 = inlined_call_operand.vmem [shape: bf16[32,32], index: 4, kind: input, shape index: {}]   ;;  %s1998_s5 = inlined_call_operand.vmem [shape: f32[1,32], index: 5, kind: input, shape index: {}]   ;;  %s1999_s6 = inlined_call_operand.vmem [shape: bf16[32,32], index: 6, kind: input, shape index: {}]   ;;  %s2000_s7 = inlined_call_operand.vmem [shape: f32[1,32], index: 7, kind: input, shape index: {}]   ;;  %s2001_s8 = inlined_call_operand.vmem [shape: bf16[32,32], index: 8, kind: input, shape index: {}]   ;;  %s2002_s9 = inlined_call_operand.vmem [shape: f32[1,32], index: 9, kind: input, shape index: {}]   ;;  %s2003_s10 = inlined_call_operand.vmem [shape: bf16[32,128], index: 10, kind: input, shape index: {}]   ;;  %s2004_s11 = inlined_call_operand.vmem [shape: f32[1,128], index: 11, kind: input, shape index: {}]   ;;  %s2005_s12 = inlined_call_operand.vmem [shape: bf16[512,32], index: 12, kind: input, shape index: {}]   ;;  %s2006_s13 = inlined_call_operand.vmem [shape: bf16[128,32], index: 13, kind: input, shape index: {}]   ;;  %s2007_s14 = inlined_call_operand.vmem [shape: f32[1,32], index: 14, kind: input, shape index: {}]   ;;  %s2008_s15 = inlined_call_operand.vmem [shape: bf16[32,32], index: 15, kind: input, shape index: {}]   ;;  %s2009_s16 = inlined_call_operand.vmem [shape: f32[1,32], index: 16, kind: input, shape index: {}]   ;;  %s2010_s17 = inlined_call_operand.vmem [shape: bf16[32,32], index: 17, kind: input, shape index: {}]   ;;  %s2011_s18 = inlined_call_operand.vmem [shape: f32[1,32], index: 18, kind: input, shape index: {}]   ;;  %s2012_s19 = inlined_call_operand.vmem [shape: bf16[32,128], index: 19, kind: input, shape index: {}]   ;;  %s2013_s20 = inlined_call_operand.vmem [shape: f32[1,128], index: 20, kind: input, shape index: {}]   ;;  %s2014_s21 = inlined_call_operand.vmem [shape: f32[2,128], index: 21, kind: output, shape index: {0}]   ;;  %s2015_s22 = inlined_call_operand.hbm [shape: f32[2,128], index: 22, kind: output, shape index: {1}]  }
   0x1   :  { %2019 = sst [smem:[#allocation5_spill]] %s1993_s0 }
   0x2   :  { %2020 = sst [smem:[#allocation6_spill]] %s1994_s1 }
   0x3   :  { %2021 = sst [smem:[#allocation7_spill]] %s1995_s2 }
   0x4   :  { %2022 = sst [smem:[#allocation8_spill]] %s1996_s3 }
   0x5   :  { %2023 = sst [smem:[#allocation9_spill]] %s1997_s4 }
   0x6   :  { %2024 = sst [smem:[#allocation10_spill]] %s1998_s5 }
   0x7   :  { %2025 = sst [smem:[#allocation11_spill]] %s1999_s6 }
   0x8   :  { %s2026_s29 = sld [smem:[#allocation7_spill]] }
   0x9   :  { %s2027_s30 = sld [smem:[#allocation5_spill]] }
   0xe   :  { %v1454_v0 = vld [vmem:[%s2026_s29 + $0x38] sm:$0xff]  ;;  %v1453_v4 = vld [vmem:[%s2026_s29 + $0x30] sm:$0xff]  ;;  %v1452_v8 = vld [vmem:[%s2026_s29 + $0x28] sm:$0xff] }
   0xf   :  { %v1462_v1 = vld [vmem:[%s2026_s29 + $0x78] sm:$0xff]  ;;  %344 = vmatpush.bf16.msra.mxu0 %v1454_v0  ;;  %v1461_v5 = vld [vmem:[%s2026_s29 + $0x70] sm:$0xff]  ;;  %v1460_v9 = vld [vmem:[%s2026_s29 + $0x68] sm:$0xff] }
  0x10   :  { %v1470_v2 = vld [vmem:[%s2026_s29 + $0xb8] sm:$0xff]  ;;  %357 = vmatpush.bf16.msra.mxu1 %v1462_v1  ;;  %v1469_v6 = vld [vmem:[%s2026_s29 + $0xb0] sm:$0xff]  ;;  %v1468_v10 = vld [vmem:[%s2026_s29 + $0xa8] sm:$0xff] }
  0x11   :  { %v1478_v3 = vld [vmem:[%s2026_s29 + $0xf8] sm:$0xff]  ;;  %370 = vmatpush.bf16.msra.mxu2 %v1470_v2  ;;  %v1477_v7 = vld [vmem:[%s2026_s29 + $0xf0] sm:$0xff]  ;;  %v1476_v11 = vld [vmem:[%s2026_s29 + $0xe8] sm:$0xff] }
  0x12   :  { %383 = vmatpush.bf16.msra.mxu3 %v1478_v3  ;;  %v1451_v12 = vld [vmem:[%s2026_s29 + $0x20] sm:$0xff]  ;;  %v1450_v17 = vld [vmem:[%s2026_s29 + $0x18] sm:$0xff] }
  0x13   :  { %345 = vmatpush.bf16.msra.mxu0 %v1453_v4  ;;  %v1459_v13 = vld [vmem:[%s2026_s29 + $0x60] sm:$0xff]  ;;  %v1458_v18 = vld [vmem:[%s2026_s29 + $0x58] sm:$0xff] }
  0x14   :  { %358 = vmatpush.bf16.msra.mxu1 %v1461_v5  ;;  %v72_v14 = vld [vmem:[%s2027_s30] sm:$0xf]  ;;  %v1466_v19 = vld [vmem:[%s2026_s29 + $0x98] sm:$0xff] }
  0x15   :  { %371 = vmatpush.bf16.msra.mxu2 %v1469_v6  ;;  %v1467_v15 = vld [vmem:[%s2026_s29 + $0xa0] sm:$0xff]  ;;  %143 = vst [vmem:[#allocation1] ss:$9 sm:$0xff] %v72_v14  ;;  %v1474_v20 = vld [vmem:[%s2026_s29 + $0xd8] sm:$0xff] }
  0x16   :  { %384 = vmatpush.bf16.msra.mxu3 %v1477_v7  ;;  %v1475_v16 = vld [vmem:[%s2026_s29 + $0xe0] sm:$0xff] }
  0x17   :  { %346 = vmatpush.bf16.msra.mxu0 %v1452_v8 }
  0x18   :  { %359 = vmatpush.bf16.msra.mxu1 %v1460_v9 }
  0x19   :  { %372 = vmatpush.bf16.msra.mxu2 %v1468_v10 }
  0x1a   :  { %385 = vmatpush.bf16.msra.mxu3 %v1476_v11 }
  0x1b   :  { %347 = vmatpush.bf16.msra.mxu0 %v1451_v12 }
  0x1c   :  { %360 = vmatpush.bf16.msra.mxu1 %v1459_v13 }
  0x1d   :  { %373 = vmatpush.bf16.msra.mxu2 %v1467_v15 }
  0x1e   :  { %386 = vmatpush.bf16.msra.mxu3 %v1475_v16 }
  0x1f   :  { %28 = vsyncpa [#allocation3], 0  ;;  %v1449_v21 = vld [vmem:[%s2026_s29 + $0x10] sm:$0xff]  ;;  %348 = vmatpush.bf16.msra.mxu0 %v1450_v17  ;;  %v144_v25 = vld [vmem:[#allocation1] sm:$0xff]  ;;  %s2028_s27 = sld [smem:[#allocation9_spill]]  ;;  %vm418_vm0 = vcmask 261120  }
  0x20   :  { %v1457_v22 = vld [vmem:[%s2026_s29 + $0x50] sm:$0xff]  ;;  %361 = vmatpush.bf16.msra.mxu1 %v1458_v18  ;;  %v147_v28 = vld [vmem:[#allocation1 + $0x1b] sm:$0xff]  ;;  %v1448_v29 = vld [vmem:[%s2026_s29 + $0x8] sm:$0xff]  ;;  %s2029_s4 = sld [smem:[#allocation11_spill]]  ;;  %vm1063_vm1 = vcmask 1041408  }
  0x21   :  { %v1465_v23 = vld [vmem:[%s2026_s29 + $0x90] sm:$0xff]  ;;  %374 = vmatpush.bf16.msra.mxu2 %v1466_v19  ;;  %v1456_v30 = vld [vmem:[%s2026_s29 + $0x48] sm:$0xff]  ;;  %v1447_v33 = vld [vmem:[%s2026_s29] sm:$0xff]  ;;  %s2030_s24 = sld [smem:[#allocation8_spill]] }
  0x22   :  { %v1473_v24 = vld [vmem:[%s2026_s29 + $0xd0] sm:$0xff]  ;;  %387 = vmatpush.bf16.msra.mxu3 %v1474_v20  ;;  %v1464_v31 = vld [vmem:[%s2026_s29 + $0x88] sm:$0xff]  ;;  %v1455_v34 = vld [vmem:[%s2026_s29 + $0x40] sm:$0xff]  ;;  %s2031_s28 = sld [smem:[#allocation10_spill]] }
  0x23   :  { %v145_v26 = vld [vmem:[#allocation1 + $0x9] sm:$0xff]  ;;  %v146_v27 = vld [vmem:[#allocation1 + $0x12] sm:$0xff]  ;;  %349 = vmatpush.bf16.msra.mxu0 %v1449_v21  ;;  %v1463_v35 = vld [vmem:[%s2026_s29 + $0x80] sm:$0xff]  ;;  %s2032_s2 = sld [smem:[#allocation6_spill]] }
  0x24   :  { %691 = vst [vmem:[#allocation1] ss:$9 sm:$0xff] %v72_v14  ;;  %362 = vmatpush.bf16.msra.mxu1 %v1457_v22  ;;  %v1472_v32 = vld [vmem:[%s2026_s29 + $0xc8] sm:$0xff]  ;;  %v1471_v36 = vld [vmem:[%s2026_s29 + $0xc0] sm:$0xff]  ;;  %v1526_v0 = vld [vmem:[%s2006_s13 + $0x38] sm:$0xff] }
  0x25   :  { %375 = vmatpush.bf16.msra.mxu2 %v1465_v23  ;;  %v1480_v37 = vld [vmem:[%s2028_s27 + $0x8] sm:$0xff]  ;;  %v1479_v38 = vld [vmem:[%s2028_s27] sm:$0xff]  ;;  %v1502_v1 = vld [vmem:[%s2005_s12 + $0x78] sm:$0xff] }
  0x26   :  { %388 = vmatpush.bf16.msra.mxu3 %v1473_v24  ;;  %v1482_v39 = vld [vmem:[%s2029_s4 + $0x8] sm:$0xff]  ;;  %v1481_v40 = vld [vmem:[%s2029_s4] sm:$0xff]  ;;  %v1525_v2 = vld [vmem:[%s2006_s13 + $0x30] sm:$0xff] }
  0x27   :  { %350 = vmatpush.bf16.msra.mxu0 %v1448_v29  ;;  %v1534_v41 = vld [vmem:[%s2030_s24] ss:$0 sm:$0xff]  ;;  %v1484_v56 = vld [vmem:[%s2001_s8 + $0x8] sm:$0xff]  ;;  %v1494_v3 = vld [vmem:[%s2005_s12 + $0x38] sm:$0xff] }
  0x28   :  { %363 = vmatpush.bf16.msra.mxu1 %v1456_v30  ;;  %v1483_v57 = vld [vmem:[%s2001_s8] sm:$0xff]  ;;  %v1501_v4 = vld [vmem:[%s2005_s12 + $0x70] sm:$0xff]  ;;  %v1486_v5 = vld [vmem:[%s2003_s10 + $0x8] sm:$0xff] }
  0x29   :  { %376 = vmatpush.bf16.msra.mxu2 %v1464_v31  ;;  %v1535_v58 = vld [vmem:[%s2031_s28] ss:$0 sm:$0xff]  ;;  %v1493_v6 = vld [vmem:[%s2005_s12 + $0x30] sm:$0xff]  ;;  %v1524_v8 = vld [vmem:[%s2006_s13 + $0x28] sm:$0xff] }
  0x2a   :  { %389 = vmatpush.bf16.msra.mxu3 %v1472_v32  ;;  %v1485_v7 = vld [vmem:[%s2003_s10] sm:$0xff]  ;;  %v1510_v9 = vld [vmem:[%s2005_s12 + $0xb8] sm:$0xff]  ;;  %v1500_v10 = vld [vmem:[%s2005_s12 + $0x68] sm:$0xff] }
  0x2b   :  { %351 = vmatpush.bf16.msra.mxu0 %v1447_v33  ;;  %v1492_v11 = vld [vmem:[%s2005_s12 + $0x28] sm:$0xff]  ;;  %v1523_v12 = vld [vmem:[%s2006_s13 + $0x20] sm:$0xff]  ;;  %v1509_v13 = vld [vmem:[%s2005_s12 + $0xb0] sm:$0xff] }
  0x2c   :  { %364 = vmatpush.bf16.msra.mxu1 %v1455_v34  ;;  %v1499_v14 = vld [vmem:[%s2005_s12 + $0x60] sm:$0xff]  ;;  %v1522_v16 = vld [vmem:[%s2006_s13 + $0x18] sm:$0xff]  ;;  %v1521_v18 = vld [vmem:[%s2006_s13 + $0x10] sm:$0xff] }
  0x2d   :  { %377 = vmatpush.bf16.msra.mxu2 %v1463_v35  ;;  %v1491_v15 = vld [vmem:[%s2005_s12 + $0x20] sm:$0xff]  ;;  %v1498_v17 = vld [vmem:[%s2005_s12 + $0x58] sm:$0xff]  ;;  %v1520_v20 = vld [vmem:[%s2006_s13 + $0x8] sm:$0xff] }
  0x2e   :  { %390 = vmatpush.bf16.msra.mxu3 %v1471_v36  ;;  %352 = vmatmul.bf16.vlgmr.msra.gmra.mxu0 %v144_v25  ;;  %v1536_v19 = vld [vmem:[%s2000_s7] ss:$0 sm:$0xff]  ;;  %v1518_v25 = vld [vmem:[%s2005_s12 + $0xf8] sm:$0xff]  ;;  %v1497_v30 = vld [vmem:[%s2005_s12 + $0x50] sm:$0xff] }
  0x2f   :  { %428 = vmatpush.bf16.msrb.mxu0 %v1480_v37  ;;  %365 = vmatmul.bf16.vlgmr.msra.gmra.mxu1 %v145_v26  ;;  %v1519_v23 = vld [vmem:[%s2006_s13] sm:$0xff]  ;;  %v1490_v29 = vld [vmem:[%s2005_s12 + $0x18] sm:$0xff]  ;;  %v1508_v31 = vld [vmem:[%s2005_s12 + $0xa8] sm:$0xff] }
  0x30   :  { %378 = vmatmul.bf16.vlgmr.msra.gmra.mxu2 %v146_v27  ;;  %466 = vmatpush.bf16.msrb.mxu1 %v1482_v39  ;;  %v1517_v27 = vld [vmem:[%s2005_s12 + $0xf0] sm:$0xff]  ;;  %v1516_v32 = vld [vmem:[%s2005_s12 + $0xe8] sm:$0xff]  ;;  %v1507_v35 = vld [vmem:[%s2005_s12 + $0xa0] sm:$0xff] }
  0x31   :  { %391 = vmatmul.bf16.vlgmr.msra.gmra.mxu3 %v147_v28  ;;  %504 = vmatpush.bf16.msrb.mxu2 %v1484_v56  ;;  %v1489_v33 = vld [vmem:[%s2005_s12 + $0x10] sm:$0xff]  ;;  %v1496_v34 = vld [vmem:[%s2005_s12 + $0x48] sm:$0xff]  ;;  %v1515_v36 = vld [vmem:[%s2005_s12 + $0xe0] sm:$0xff] }
  0x32   :  { %542 = vmatpush.bf16.msrb.mxu3 %v1486_v5  ;;  %v73_v37 = vld [vmem:[%s2032_s2] sm:$0x1]  ;;  %v1530_v5 = vld [vmem:[%s2010_s17 + $0x8] sm:$0xff] }
  0x33   :  { %429 = vmatpush.bf16.msrb.mxu0 %v1479_v38  ;;  %v1488_v38 = vld [vmem:[%s2005_s12 + $0x8] sm:$0xff]  ;;  %v1495_v39 = vld [vmem:[%s2005_s12 + $0x40] sm:$0xff] }
  0x34   :  { %467 = vmatpush.bf16.msrb.mxu1 %v1481_v40  ;;  %v1506_v40 = vld [vmem:[%s2005_s12 + $0x98] sm:$0xff] }
  0x35   :  { %505 = vmatpush.bf16.msrb.mxu2 %v1483_v57 }
  0x36   :  { %543 = vmatpush.bf16.msrb.mxu3 %v1485_v7  ;;  %v1529_v7 = vld [vmem:[%s2010_s17] sm:$0xff] }
  0x37   :  { %678 = vmatpush.bf16.msra.mxu0 %v1526_v0 }
  0x38   :  { %892 = vmatpush.bf16.msra.mxu1 %v1494_v3 }
  0x39   :  { %905 = vmatpush.bf16.msra.mxu2 %v1502_v1 }
  0x3a   :  { %918 = vmatpush.bf16.msra.mxu3 %v1510_v9 }
  0x3b   :  { %679 = vmatpush.bf16.msra.mxu0 %v1525_v2 }
  0x3c   :  { %893 = vmatpush.bf16.msra.mxu1 %v1493_v6  ;;  %v1538_v6 = vld [vmem:[%s2004_s11] ss:$0 sm:$0xff] }
  0x3d   :  { %906 = vmatpush.bf16.msra.mxu2 %v1501_v4  ;;  %v1527_v4 = vld [vmem:[%s2008_s15] sm:$0xff] }
  0x3e   :  { %919 = vmatpush.bf16.msra.mxu3 %v1509_v13 }
  0x3f   :  { %680 = vmatpush.bf16.msra.mxu0 %v1524_v8 }
  0x40   :  { %894 = vmatpush.bf16.msra.mxu1 %v1492_v11 }
  0x41   :  { %907 = vmatpush.bf16.msra.mxu2 %v1500_v10 }
  0x42   :  { %920 = vmatpush.bf16.msra.mxu3 %v1508_v31 }
  0x43   :  { %681 = vmatpush.bf16.msra.mxu0 %v1523_v12 }
  0x44   :  { %895 = vmatpush.bf16.msra.mxu1 %v1491_v15  ;;  %v1539_v15 = vld [vmem:[%s2007_s14] ss:$0 sm:$0xff] }
  0x45   :  { %908 = vmatpush.bf16.msra.mxu2 %v1499_v14 }
  0x46   :  { %921 = vmatpush.bf16.msra.mxu3 %v1507_v35  ;;  %v1542_v35 = vld [vmem:[%s2013_s20] ss:$0 sm:$0xff]  ;;  %s1085_s20 = sshll.u32 %s2015_s22, 4  ;;  %s1086_s20 = int_to_ptr.hbm [resolvable:$true] %s1085_s20 }
  0x47   :  { %682 = vmatpush.bf16.msra.mxu0 %v1522_v16 }
  0x48   :  { %896 = vmatpush.bf16.msra.mxu1 %v1490_v29  ;;  %v1541_v29 = vld [vmem:[%s2011_s18] ss:$0 sm:$0xff]  ;;  %s1573_s18 = smov [#allocation2]  }
  0x49   :  { %909 = vmatpush.bf16.msra.mxu2 %v1498_v17  ;;  %s1083_s3 = sshll.u32 %s1573_s18, 4  ;;  %s1084_s3 = int_to_ptr.vmem [resolvable:$true] %s1083_s3 }
  0x4a   :  { %922 = vmatpush.bf16.msra.mxu3 %v1506_v40 }
  0x4b   :  { %683 = vmatpush.bf16.msra.mxu0 %v1521_v18 }
  0x4c   :  { %897 = vmatpush.bf16.msra.mxu1 %v1489_v33 }
  0x4d   :  { %910 = vmatpush.bf16.msra.mxu2 %v1497_v30 }
  0x4f   :  { %684 = vmatpush.bf16.msra.mxu0 %v1520_v20 }
  0x50   :  { %898 = vmatpush.bf16.msra.mxu1 %v1488_v38 }
  0x51   :  { %911 = vmatpush.bf16.msra.mxu2 %v1496_v34 }
  0x53   :  { %685 = vmatpush.bf16.msra.mxu0 %v1519_v23  ;;  %v1540_v23 = vld [vmem:[%s2009_s16] ss:$0 sm:$0xff] }
  0x55   :  { %912 = vmatpush.bf16.msra.mxu2 %v1495_v39 }
  0xab   :  { %v353_v42 = vpop.f32.mrf.mxu0 }
  0xac   :  { %v366_v43 = vpop.f32.mrf.mxu1  ;;  %v354_v44 = vadd.f32 %v1534_v41, %v353_v42  ;;  %v1514_v41 = vld [vmem:[%s2005_s12 + $0xd8] sm:$0xff]  ;;  %v693_v42 = vld [vmem:[#allocation1 + $0x9] sm:$0xff] }
  0xae   :  { %v367_v45 = vadd.f32 %v366_v43, %v354_v44  ;;  %v1487_v43 = vld [vmem:[%s2005_s12] sm:$0xff]  ;;  %v1505_v44 = vld [vmem:[%s2005_s12 + $0x90] sm:$0xff] }
  0xaf   :  { %899 = vmatpush.bf16.msra.mxu1 %v1487_v43  ;;  %923 = vmatpush.bf16.msra.mxu3 %v1505_v44 }
  0xb3   :  { %v379_v46 = vpop.f32.mrf.mxu2  ;;  %v355_v49 = vpop.f32.mrf.mxu0 }
  0xb4   :  { %v392_v47 = vpop.f32.mrf.mxu3  ;;  %v380_v48 = vadd.f32 %v379_v46, %v367_v45  ;;  %v368_v50 = vpop.f32.mrf.mxu1  ;;  %v1513_v45 = vld [vmem:[%s2005_s12 + $0xd0] sm:$0xff]  ;;  %v692_v46 = vld [vmem:[#allocation1] sm:$0xff] }
  0xb5   :  { %v1503_v49 = vld [vmem:[%s2005_s12 + $0x80] sm:$0xff] }
  0xb6   :  { %v393_v51 = vadd.f32 %v392_v47, %v380_v48  ;;  %v1504_v47 = vld [vmem:[%s2005_s12 + $0x88] sm:$0xff]  ;;  %v1511_v50 = vld [vmem:[%s2005_s12 + $0xc0] sm:$0xff] }
  0xb7   :  { %v1512_v48 = vld [vmem:[%s2005_s12 + $0xc8] sm:$0xff]  ;;  %924 = vmatpush.bf16.msra.mxu3 %v1504_v47 }
  0xb8   :  { %v396_v52 = vmax.f32 %v393_v51, 0.0  ;;  %v695_v51 = vld [vmem:[#allocation1 + $0x1b] sm:$0xff] }
  0xba   :  { %v397_v53 = vpack.c.bf16 %v396_v52, %v396_v52  ;;  %v1537_v52 = vld [vmem:[%s2002_s9] ss:$0 sm:$0xff] }
  0xbb   :  { %v381_v54 = vpop.f32.mrf.mxu2  ;;  %925 = vmatpush.bf16.msra.mxu3 %v1503_v49 }
  0xbc   :  { %v394_v55 = vpop.f32.mrf.mxu3  ;;  %1232 = vmatmul.msk.bf16.vlgmr.msrb.gmra.mxu0 %vm418_vm0, %v397_v53 }
  0xbd   :  { %931 = vmatpush.bf16.msrb.mxu0 %v1518_v25 }
  0xc1   :  { %932 = vmatpush.bf16.msrb.mxu0 %v1517_v27 }
  0xc5   :  { %933 = vmatpush.bf16.msrb.mxu0 %v1516_v32 }
  0xc9   :  { %934 = vmatpush.bf16.msrb.mxu0 %v1515_v36 }
  0xcc   :  { %686 = vmatmul.bf16.vlgmr.msra.gmra.mxu0 %v73_v37 }
  0xcd   :  { %935 = vmatpush.bf16.msrb.mxu0 %v1514_v41 }
  0xd1   :  { %936 = vmatpush.bf16.msrb.mxu0 %v1513_v45 }
  0xd5   :  { %937 = vmatpush.bf16.msrb.mxu0 %v1512_v48 }
  0xd9   :  { %938 = vmatpush.bf16.msrb.mxu0 %v1511_v50 }
  0xdc   :  { %939 = vmatmul.bf16.vlgmr.msrb.gmra.mxu0 %v695_v51 }
 0x139   :  { %v431_v59 = vpop.f32.mrf.mxu0 }
 0x13a   :  { %v432_v60 = vadd.f32 %v1535_v58, %v431_v59  ;;  %v694_v58 = vld [vmem:[#allocation1 + $0x12] sm:$0xff] }
 0x13c   :  { %v435_v61 = vmax.f32 %v432_v60, 0.0 }
 0x13e   :  { %v436_v62 = vpack.c.bf16 %v435_v61, %v435_v61 }
 0x140   :  { %1241 = vmatmul.msk.bf16.vlgmr.msrb.gmra.mxu1 %vm418_vm0, %v436_v62 }
 0x141   :  { %v433_v63 = vpop.f32.mrf.mxu0 }
 0x142   :  { %v1528_v63 = vld [vmem:[%s2008_s15 + $0x8] sm:$0xff] }
 0x143   :  { %980 = vmatpush.bf16.msrb.mxu1 %v1528_v63 }
 0x147   :  { %981 = vmatpush.bf16.msrb.mxu1 %v1527_v4 }
 0x149   :  { %v687_v59 = vpop.f32.mrf.mxu0 }
 0x150   :  { %900 = vmatmul.bf16.vlgmr.msra.gmra.mxu1 %v692_v46 }
 0x151   :  { %v689_v60 = vpop.f32.mrf.mxu0 }
 0x159   :  { %v940_v1 = vpop.f32.mrf.mxu0 }
 0x161   :  { %v942_v3 = vpop.f32.mrf.mxu0 }
 0x1bd   :  { %v469_v21 = vpop.f32.mrf.mxu1 }
 0x1be   :  { %v470_v22 = vadd.f32 %v1536_v19, %v469_v21  ;;  %v1532_v21 = vld [vmem:[%s2012_s19 + $0x8] sm:$0xff] }
 0x1c0   :  { %v473_v24 = vmax.f32 %v470_v22, 0.0  ;;  %v1531_v22 = vld [vmem:[%s2012_s19] sm:$0xff] }
 0x1c2   :  { %v474_v26 = vpack.c.bf16 %v473_v24, %v473_v24 }
 0x1c4   :  { %1250 = vmatmul.msk.bf16.vlgmr.msrb.gmra.mxu2 %vm418_vm0, %v474_v26 }
 0x1c5   :  { %v471_v28 = vpop.f32.mrf.mxu1  ;;  %1018 = vmatpush.bf16.msrb.mxu2 %v1530_v5 }
 0x1c9   :  { %1019 = vmatpush.bf16.msrb.mxu2 %v1529_v7 }
 0x1cd   :  { %v901_v61 = vpop.f32.mrf.mxu1 }
 0x1ce   :  { %v902_v11 = vadd.f32 %v901_v61, %v687_v59 }
 0x1d4   :  { %913 = vmatmul.bf16.vlgmr.msra.gmra.mxu2 %v693_v42 }
 0x1d5   :  { %v903_v0 = vpop.f32.mrf.mxu1 }
 0x247   :  { %v507_v53 = vpop.f32.mrf.mxu2 }
 0x248   :  { %v508_v54 = vadd.f32 %v1537_v52, %v507_v53 }
 0x24a   :  { %v511_v55 = vmax.f32 %v508_v54, 0.0 }
 0x24c   :  { %v512_v56 = vpack.c.bf16 %v511_v55, %v511_v55 }
 0x24e   :  { %1259 = vmatmul.msk.bf16.vlgmr.msrb.gmra.mxu3 %vm418_vm0, %v512_v56 }
 0x24f   :  { %v509_v57 = vpop.f32.mrf.mxu2  ;;  %1056 = vmatpush.bf16.msrb.mxu3 %v1532_v21 }
 0x253   :  { %1057 = vmatpush.bf16.msrb.mxu3 %v1531_v22 }
 0x257   :  { %v914_v62 = vpop.f32.mrf.mxu2 }
 0x258   :  { %v915_v12 = vadd.f32 %v914_v62, %v902_v11 }
 0x25e   :  { %926 = vmatmul.bf16.vlgmr.msra.gmra.mxu3 %v694_v58 }
 0x25f   :  { %v916_v2 = vpop.f32.mrf.mxu2 }
 0x2d1   :  { %v545_v8 = vpop.f32.mrf.mxu3 }
 0x2d2   :  { %v546_v9 = vadd.f32 %v1538_v6, %v545_v8 }
 0x2d4   :  { %549 = vst [vmem:[%s2014_s21] sm:$0x3] %v546_v9 }
 0x2d9   :  { %v547_v10 = vpop.f32.mrf.mxu3 }
 0x2e1   :  { %v927_v13 = vpop.f32.mrf.mxu3 }
 0x2e2   :  { %v928_v14 = vadd.f32 %v927_v13, %v915_v12 }
 0x2e4   :  { %v941_v16 = vadd.f32 %v940_v1, %v928_v14 }
 0x2e6   :  { %v948_v17 = vadd.f32 %v1539_v15, %v941_v16 }
 0x2e8   :  { %v949_v18 = vmax.f32 %v948_v17, 0.0 }
 0x2e9   :  { %v929_v19 = vpop.f32.mrf.mxu3 }
 0x2ea   :  { %v950_v20 = vpack.c.bf16 %v949_v18, %v949_v18 }
 0x2ec   :  { %1428 = vmatmul.msk.bf16.vlgmr.msrb.gmra.mxu1 %vm418_vm0, %v950_v20 }
 0x369   :  { %v983_v24 = vpop.f32.mrf.mxu1 }
 0x36a   :  { %v984_v25 = vadd.f32 %v1540_v23, %v983_v24 }
 0x36c   :  { %v987_v26 = vmax.f32 %v984_v25, 0.0 }
 0x36e   :  { %v988_v27 = vpack.c.bf16 %v987_v26, %v987_v26 }
 0x370   :  { %1437 = vmatmul.msk.bf16.vlgmr.msrb.gmra.mxu2 %vm418_vm0, %v988_v27 }
 0x371   :  { %v985_v28 = vpop.f32.mrf.mxu1 }
 0x3f3   :  { %v1021_v30 = vpop.f32.mrf.mxu2 }
 0x3f4   :  { %v1022_v31 = vadd.f32 %v1541_v29, %v1021_v30 }
 0x3f6   :  { %v1025_v32 = vmax.f32 %v1022_v31, 0.0 }
 0x3f8   :  { %v1026_v33 = vpack.c.bf16 %v1025_v32, %v1025_v32 }
 0x3fa   :  { %1446 = vmatmul.msk.bf16.vlgmr.msrb.gmra.mxu3 %vm418_vm0, %v1026_v33 }
 0x3fb   :  { %v1023_v34 = vpop.f32.mrf.mxu2 }
 0x47d   :  { %v1059_v36 = vpop.f32.mrf.mxu3 }
 0x47e   :  { %v1060_v37 = vadd.f32 %v1542_v35, %v1059_v36 }
 0x480   :  { %v1064_v38 = vsel %vm1063_vm1, %v1060_v37, -inf }
 0x481   :  { %1065 = vmax.xlane.f32.xlu0 %v1064_v38 }
 0x485   :  { %v1061_v39 = vpop.f32.mrf.mxu3 }
 0x4f4   :  { %v1066_v40 = vpop.xlane.xlu0 %1065 }
 0x4f5   :  { %v1067_v41 = vsub.f32 %v1060_v37, %v1066_v40 }
 0x4f7   :  { %v1068_v42 = vmul.f32 1.442695, %v1067_v41 }
 0x4f9   :  { %1543 = vpow2.f32 %v1068_v42 }
 0x4ff   :  { %v1544_v43 = vpop.eup %1543 }
 0x500   :  { %v1070_v44 = vsel %vm1063_vm1, %v1544_v43, 0.0 }
 0x501   :  { %1071 = vadd.xlane.f32.xlu0 %v1070_v44 }
 0x574   :  { %v1072_v45 = vpop.xlane.xlu0 %1071 }
 0x575   :  { %1545 = vrcp.f32 %v1072_v45 }
 0x57b   :  { %v1546_v46 = vpop.eup %1545 }
 0x57c   :  { %v1074_v47 = vmul.f32 %v1546_v46, %v1544_v43 }
 0x57e   :  { %1075 = vst [vmem:[#allocation2] sm:$0x3] %v1074_v47 }
 0x57f   :  { %1088 = dma.vmem_to_hbm [thread:$0]  %s1084_s3, 32, %s1086_s20, [#allocation3]  }
 0x580   :  { %1571 = dma.done.wait [#allocation3], 32  }
 0x581   :  { %1572 = vsyncadd [#allocation3], 4294967264 }
 0x582   :  { %1095 = vsyncpa [#allocation3], 1 }

</bundles_post_ra>
